<compile_context>
chip_gen: v6e
topology: v6e:2x2x1
jax: 0.10.0
libtpu: 0.0.40
codegen_flags: <defaults>
</compile_context>

<pallas_src>
import jax
import jax.numpy as jnp
import numpy as np
from jax.experimental import pallas as pl
from jax.experimental.pallas import tpu as pltpu

# ----- module hyper-parameters (small, TPU-friendly) -----
OUTPUT_DIM = 16    # vocab size
EMB_DIM    = 32
HID_DIM    = 32
N_LAYERS   = 2
BATCH      = 8
DROPOUT    = 0.0   # eval-mode forward -> dropout is identity

LANES   = 4 * HID_DIM               # 128: gate width == one f32 vreg of lanes
STATE_W = 2 * N_LAYERS * HID_DIM    # 128: packed state width (h0|h1|c0|c1)
assert LANES >= max(EMB_DIM, OUTPUT_DIM)


def _round_up(n, m):
    return (n + m - 1) // m * m


# --- packed weight-slab layout (rows x 128 lanes), computed at import time ---
# Layer l weight block: [in_l + H, 4H] with in_0 = OUTPUT_DIM (embedding folded
# into the layer-0 input weights) and in_l = HID_DIM for l > 0.
_off = 0
_W_OFF, _W_ROWS = [], []
for _l in range(N_LAYERS):
    _in = OUTPUT_DIM if _l == 0 else HID_DIM
    _W_OFF.append(_off)
    _W_ROWS.append(_in + HID_DIM)
    _off += _round_up(_in + HID_DIM, 8)
_B_OFF = _off                        # rows: per-layer bias, fc_b, post_scale, post_offset
_off += _round_up(N_LAYERS + 3, 8)
_FCW_OFF = _off                      # fc_w.T padded into lanes [0, OUTPUT_DIM)
_off += _round_up(HID_DIM, 8)
_SLAB_ROWS = _round_up(_off, 8)      # = 152 for the default sizes


# ---------------------------------------------------------------------------
# Pallas kernel: one-hot -> fused LSTM cell per layer -> fc_out.
# ---------------------------------------------------------------------------
def _decoder_kernel(tok_ref, state_ref, slab_ref, state_out_ref, pred_out_ref):
    H = HID_DIM
    tok = tok_ref[...]                                   # [B, 1] int32
    B = tok.shape[0]

    # Token one-hot; the embedding lookup itself is folded into the layer-0
    # weight block (emb @ w_ih0.T), so no separate embedding matmul is needed.
    # Dropout on the embedding is identity (eval mode).
    onehot = (jax.lax.broadcasted_iota(jnp.int32, (B, OUTPUT_DIM), 1)
              == tok).astype(jnp.float32)                # [B, V]

    state = state_ref[...]                               # [B, 128] = h0|h1|c0|c1
    # Per-lane affine fixup turning sigmoid into tanh on the g-gate lanes:
    #   act = post_scale * sigmoid(gates) + post_offset
    # (g columns of W/b were pre-scaled by 2 at pack time).
    post_scale  = slab_ref[_B_OFF + N_LAYERS + 1:_B_OFF + N_LAYERS + 2, :]  # [1, 4H]
    post_offset = slab_ref[_B_OFF + N_LAYERS + 2:_B_OFF + N_LAYERS + 3, :]  # [1, 4H]

    x = onehot
    h_new_all, c_new_all = [], []
    for l in range(N_LAYERS):                            # unrolled at trace time
        h_prev = state[:, l * H:(l + 1) * H]
        c_prev = state[:, (N_LAYERS + l) * H:(N_LAYERS + l + 1) * H]
        w = slab_ref[_W_OFF[l]:_W_OFF[l] + _W_ROWS[l], :]        # [in+H, 4H]
        b = slab_ref[_B_OFF + l:_B_OFF + l + 1, :]               # [1, 4H]

        # Single fused matmul per layer: [x, h_prev] @ [w_x ; w_hh.T].
        xh = jnp.concatenate([x, h_prev], axis=1)                # [B, in+H]
        gates = jnp.dot(xh, w, preferred_element_type=jnp.float32) + b  # [B, 4H]

        # One full-vreg sigmoid (EUP) + one fused per-lane affine fixup; the
        # g-gate lanes come out as tanh(g_raw), the rest as sigmoid.
        act = jax.nn.sigmoid(gates) * post_scale + post_offset

        i_g = act[:, 0 * H:1 * H]
        f_g = act[:, 1 * H:2 * H]
        g_g = act[:, 2 * H:3 * H]
        o_g = act[:, 3 * H:4 * H]

        c_new = f_g * c_prev + i_g * g_g
        h_new = o_g * jnp.tanh(c_new)
        h_new_all.append(h_new)
        c_new_all.append(c_new)
        x = h_new                                        # inter-layer dropout = id

    # fc_out on the top-layer output; padded lanes stay exactly zero.
    pred = (jnp.dot(x, slab_ref[_FCW_OFF:_FCW_OFF + HID_DIM, :],
                    preferred_element_type=jnp.float32)
            + slab_ref[_B_OFF + N_LAYERS:_B_OFF + N_LAYERS + 1, :])   # [B, 128]

    # Lane-dense outputs: one full-vreg store each (no masked partial stores).
    state_out_ref[...] = jnp.concatenate(h_new_all + c_new_all, axis=1)  # [B, 128]
    pred_out_ref[...] = pred


# ---------------------------------------------------------------------------
# One-time parameter packing (transposes, embedding fold, bias fusion and the
# sigmoid->tanh gate pre-scaling all hoisted here).
# ---------------------------------------------------------------------------
def pack_params(params):
    H = HID_DIM
    slab = jnp.zeros((_SLAB_ROWS, LANES), jnp.float32)
    # Lane scale: 2 on the g-gate lanes [2H, 3H), 1 elsewhere.
    col_scale = jnp.ones((LANES,), jnp.float32).at[2 * H:3 * H].set(2.0)
    post_offset = jnp.zeros((LANES,), jnp.float32).at[2 * H:3 * H].set(-1.0)

    for l in range(N_LAYERS):
        w_ih, w_hh, b_ih, b_hh = params["lstm"][l]
        w_x = w_ih.T                                            # [in, 4H]
        if l == 0:
            w_x = params["embedding"] @ w_x                     # fold embedding: [V, 4H]
        w = jnp.concatenate([w_x, w_hh.T], axis=0) * col_scale  # [in+H, 4H]
        slab = slab.at[_W_OFF[l]:_W_OFF[l] + _W_ROWS[l], :].set(w)
        slab = slab.at[_B_OFF + l, :].set((b_ih + b_hh) * col_scale)

    slab = slab.at[_B_OFF + N_LAYERS, :OUTPUT_DIM].set(params["fc_b"])
    slab = slab.at[_B_OFF + N_LAYERS + 1, :].set(col_scale)     # post_scale
    slab = slab.at[_B_OFF + N_LAYERS + 2, :].set(post_offset)   # post_offset
    slab = slab.at[_FCW_OFF:_FCW_OFF + HID_DIM, :OUTPUT_DIM].set(params["fc_w"].T)
    return slab


# ---------------------------------------------------------------------------
# Core step on packed state (lane-dense I/O, state buffer aliased/donated).
# ---------------------------------------------------------------------------
@jax.jit
def decoder_step_packed(tok2d, state_packed, slab):
    B = tok2d.shape[0]
    vmem = pl.BlockSpec(memory_space=pltpu.MemorySpace.VMEM)
    state_out, pred_pad = pl.pallas_call(
        _decoder_kernel,
        out_shape=(jax.ShapeDtypeStruct((B, STATE_W), jnp.float32),
                   jax.ShapeDtypeStruct((B, LANES), jnp.float32)),
        in_specs=[vmem, vmem, vmem],
        out_specs=(vmem, vmem),
        input_output_aliases={1: 0},        # packed state in aliases state out
    )(tok2d, state_packed, slab)
    return state_out, pred_pad


# ---------------------------------------------------------------------------
# PyTorch-interface wrapper (tokens [B]; hidden/cell [n_layers, B, hid]).
# ---------------------------------------------------------------------------
@jax.jit
def decoder_forward(tokens, hidden, cell, slab):
    B = tokens.shape[0]
    tok2d = tokens.reshape(B, 1).astype(jnp.int32)
    h_flat = jnp.transpose(hidden, (1, 0, 2)).reshape(B, N_LAYERS * HID_DIM)
    c_flat = jnp.transpose(cell, (1, 0, 2)).reshape(B, N_LAYERS * HID_DIM)
    state = jnp.concatenate([h_flat, c_flat], axis=1)            # [B, 2*L*H]

    state_out, pred_pad = decoder_step_packed(tok2d, state, slab)

    pred = pred_pad[:, :OUTPUT_DIM]
    hc = state_out.reshape(B, 2, N_LAYERS, HID_DIM)
    h_out = jnp.transpose(hc[:, 0], (1, 0, 2))                   # [L, B, H]
    c_out = jnp.transpose(hc[:, 1], (1, 0, 2))
    return pred, h_out, c_out


# ---------------------------------------------------------------------------
# Pure-JAX reference (mirrors torch semantics) for a correctness check.
# ---------------------------------------------------------------------------
def decoder_forward_ref(tokens, hidden, cell, params):
    x = params["embedding"][tokens]
    h_out, c_out = [], []
    for l in range(N_LAYERS):
        w_ih, w_hh, b_ih, b_hh = params["lstm"][l]
        gates = x @ w_ih.T + b_ih + hidden[l] @ w_hh.T + b_hh
        H = HID_DIM
        i = jax.nn.sigmoid(gates[:, 0 * H:1 * H])
        f = jax.nn.sigmoid(gates[:, 1 * H:2 * H])
        g = jnp.tanh(gates[:, 2 * H:3 * H])
        o = jax.nn.sigmoid(gates[:, 3 * H:4 * H])
        c_new = f * cell[l] + i * g
        h_new = o * jnp.tanh(c_new)
        h_out.append(h_new)
        c_out.append(c_new)
        x = h_new
    pred = x @ params["fc_w"].T + params["fc_b"]
    return pred, jnp.stack(h_out), jnp.stack(c_out)


def init_params(key):
    keys = jax.random.split(key, 4 + 4 * N_LAYERS)
    params = {
        "embedding": 0.1 * jax.random.normal(keys[0], (OUTPUT_DIM, EMB_DIM),
                                             jnp.float32),
        "fc_w": 0.1 * jax.random.normal(keys[1], (OUTPUT_DIM, HID_DIM),
                                        jnp.float32),
        "fc_b": 0.1 * jax.random.normal(keys[2], (OUTPUT_DIM,), jnp.float32),
        "lstm": [],
    }
    for l in range(N_LAYERS):
        in_dim = EMB_DIM if l == 0 else HID_DIM
        k = keys[4 + 4 * l: 8 + 4 * l]
        params["lstm"].append((
            0.1 * jax.random.normal(k[0], (4 * HID_DIM, in_dim), jnp.float32),
            0.1 * jax.random.normal(k[1], (4 * HID_DIM, HID_DIM), jnp.float32),
            0.1 * jax.random.normal(k[2], (4 * HID_DIM,), jnp.float32),
            0.1 * jax.random.normal(k[3], (4 * HID_DIM,), jnp.float32),
        ))
    return params


if __name__ == "__main__":
    key = jax.random.PRNGKey(0)
    kp, kt, kh, kc = jax.random.split(key, 4)

    params = init_params(kp)
    slab = pack_params(params)                       # one-time weight packing

    tokens = jax.random.randint(kt, (BATCH,), 0, OUTPUT_DIM, dtype=jnp.int32)
    hidden = 0.1 * jax.random.normal(kh, (N_LAYERS, BATCH, HID_DIM), jnp.float32)
    cell   = 0.1 * jax.random.normal(kc, (N_LAYERS, BATCH, HID_DIM), jnp.float32)

    pred, h_out, c_out = decoder_forward(tokens, hidden, cell, slab)
    jax.block_until_ready((pred, h_out, c_out))

    pred_r, h_r, c_r = decoder_forward_ref(tokens, hidden, cell, params)
    np.testing.assert_allclose(np.asarray(pred), np.asarray(pred_r),
                               rtol=1e-5, atol=1e-5)
    np.testing.assert_allclose(np.asarray(h_out), np.asarray(h_r),
                               rtol=1e-5, atol=1e-5)
    np.testing.assert_allclose(np.asarray(c_out), np.asarray(c_r),
                               rtol=1e-5, atol=1e-5)

    print("KERNEL_OK")
</pallas_src>

<mosaic_0001>
module attributes {stable_mosaic.version = 11 : i64} {
  func.func @_decoder_kernel(%arg0: memref<8x1xi32, #tpu.memory_space<vmem>>, %arg1: memref<8x128xf32, #tpu.memory_space<vmem>>, %arg2: memref<152x128xf32, #tpu.memory_space<vmem>>, %arg3: memref<8x128xf32, #tpu.memory_space<vmem>>, %arg4: memref<8x128xf32, #tpu.memory_space<vmem>>) attributes {dimension_semantics = [], scalar_prefetch = 0 : i64, scratch_operands = 0 : i64, tpu.core_type = #tpu.core_type<tc>} {
    %c0 = arith.constant 0 : index
    %c0_0 = arith.constant 0 : index
    %0 = vector.load %arg0[%c0, %c0_0] : memref<8x1xi32, #tpu.memory_space<vmem>>, vector<8x1xi32>
    %1 = tpu.iota {dimensions = array<i32: 1>} : vector<8x16xi32>
    %2 = vector.broadcast %0 : vector<8x1xi32> to vector<8x16xi32>
    %3 = arith.cmpi eq, %1, %2 : vector<8x16xi32>
    %4 = arith.extui %3 : vector<8x16xi1> to vector<8x16xi32>
    %5 = arith.sitofp %4 : vector<8x16xi32> to vector<8x16xf32>
    %c0_1 = arith.constant 0 : index
    %c0_2 = arith.constant 0 : index
    %6 = vector.load %arg1[%c0_1, %c0_2] : memref<8x128xf32, #tpu.memory_space<vmem>>, vector<8x128xf32>
    %c115 = arith.constant 115 : index
    %c0_3 = arith.constant 0 : index
    %7 = vector.load %arg2[%c115, %c0_3] : memref<152x128xf32, #tpu.memory_space<vmem>>, vector<1x128xf32>
    %c116 = arith.constant 116 : index
    %c0_4 = arith.constant 0 : index
    %8 = vector.load %arg2[%c116, %c0_4] : memref<152x128xf32, #tpu.memory_space<vmem>>, vector<1x128xf32>
    %9 = vector.extract_strided_slice %6 {offsets = [0, 0], sizes = [8, 32], strides = [1, 1]} : vector<8x128xf32> to vector<8x32xf32>
    %10 = vector.extract_strided_slice %6 {offsets = [0, 64], sizes = [8, 32], strides = [1, 1]} : vector<8x128xf32> to vector<8x32xf32>
    %c0_5 = arith.constant 0 : index
    %c0_6 = arith.constant 0 : index
    %11 = vector.load %arg2[%c0_5, %c0_6] : memref<152x128xf32, #tpu.memory_space<vmem>>, vector<48x128xf32>
    %c112 = arith.constant 112 : index
    %c0_7 = arith.constant 0 : index
    %12 = vector.load %arg2[%c112, %c0_7] : memref<152x128xf32, #tpu.memory_space<vmem>>, vector<1x128xf32>
    %13 = tpu.concatenate %5, %9 in 1 : vector<8x16xf32>, vector<8x32xf32> -> vector<8x48xf32>
    %cst = arith.constant dense<0.000000e+00> : vector<8x128xf32>
    %14 = tpu.matmul %13, %11, %cst {dimension_numbers = #tpu.dot_dimension_numbers<[1], [0], [0], [1], [0, 0, 1, 1], [], []>} : vector<8x48xf32>, vector<48x128xf32>, vector<8x128xf32> -> vector<8x128xf32>
    %15 = vector.broadcast %12 : vector<1x128xf32> to vector<8x128xf32>
    %16 = arith.addf %14, %15 : vector<8x128xf32>
    %17 = arith.negf %16 : vector<8x128xf32>
    %18 = math.exp %17 : vector<8x128xf32>
    %cst_8 = arith.constant 1.000000e+00 : f32
    %19 = vector.broadcast %cst_8 : f32 to vector<8x128xf32>
    %20 = arith.addf %19, %18 : vector<8x128xf32>
    %21 = arith.divf %19, %20 : vector<8x128xf32>
    %22 = vector.broadcast %7 : vector<1x128xf32> to vector<8x128xf32>
    %23 = arith.mulf %21, %22 : vector<8x128xf32>
    %24 = vector.broadcast %8 : vector<1x128xf32> to vector<8x128xf32>
    %25 = arith.addf %23, %24 : vector<8x128xf32>
    %26 = vector.extract_strided_slice %25 {offsets = [0, 0], sizes = [8, 32], strides = [1, 1]} : vector<8x128xf32> to vector<8x32xf32>
    %27 = vector.extract_strided_slice %25 {offsets = [0, 32], sizes = [8, 32], strides = [1, 1]} : vector<8x128xf32> to vector<8x32xf32>
    %28 = vector.extract_strided_slice %25 {offsets = [0, 64], sizes = [8, 32], strides = [1, 1]} : vector<8x128xf32> to vector<8x32xf32>
    %29 = vector.extract_strided_slice %25 {offsets = [0, 96], sizes = [8, 32], strides = [1, 1]} : vector<8x128xf32> to vector<8x32xf32>
    %30 = arith.mulf %27, %10 : vector<8x32xf32>
    %31 = arith.mulf %26, %28 : vector<8x32xf32>
    %32 = arith.addf %30, %31 : vector<8x32xf32>
    %33 = math.tanh %32 : vector<8x32xf32>
    %34 = arith.mulf %29, %33 : vector<8x32xf32>
    %35 = vector.extract_strided_slice %6 {offsets = [0, 32], sizes = [8, 32], strides = [1, 1]} : vector<8x128xf32> to vector<8x32xf32>
    %36 = vector.extract_strided_slice %6 {offsets = [0, 96], sizes = [8, 32], strides = [1, 1]} : vector<8x128xf32> to vector<8x32xf32>
    %c48 = arith.constant 48 : index
    %c0_9 = arith.constant 0 : index
    %37 = vector.load %arg2[%c48, %c0_9] : memref<152x128xf32, #tpu.memory_space<vmem>>, vector<64x128xf32>
    %c113 = arith.constant 113 : index
    %c0_10 = arith.constant 0 : index
    %38 = vector.load %arg2[%c113, %c0_10] : memref<152x128xf32, #tpu.memory_space<vmem>>, vector<1x128xf32>
    %39 = tpu.concatenate %34, %35 in 1 : vector<8x32xf32>, vector<8x32xf32> -> vector<8x64xf32>
    %cst_11 = arith.constant dense<0.000000e+00> : vector<8x128xf32>
    %40 = tpu.matmul %39, %37, %cst_11 {dimension_numbers = #tpu.dot_dimension_numbers<[1], [0], [0], [1], [0, 0, 1, 1], [], []>} : vector<8x64xf32>, vector<64x128xf32>, vector<8x128xf32> -> vector<8x128xf32>
    %41 = vector.broadcast %38 : vector<1x128xf32> to vector<8x128xf32>
    %42 = arith.addf %40, %41 : vector<8x128xf32>
    %43 = arith.negf %42 : vector<8x128xf32>
    %44 = math.exp %43 : vector<8x128xf32>
    %cst_12 = arith.constant 1.000000e+00 : f32
    %45 = vector.broadcast %cst_12 : f32 to vector<8x128xf32>
    %46 = arith.addf %45, %44 : vector<8x128xf32>
    %47 = arith.divf %45, %46 : vector<8x128xf32>
    %48 = vector.broadcast %7 : vector<1x128xf32> to vector<8x128xf32>
    %49 = arith.mulf %47, %48 : vector<8x128xf32>
    %50 = vector.broadcast %8 : vector<1x128xf32> to vector<8x128xf32>
    %51 = arith.addf %49, %50 : vector<8x128xf32>
    %52 = vector.extract_strided_slice %51 {offsets = [0, 0], sizes = [8, 32], strides = [1, 1]} : vector<8x128xf32> to vector<8x32xf32>
    %53 = vector.extract_strided_slice %51 {offsets = [0, 32], sizes = [8, 32], strides = [1, 1]} : vector<8x128xf32> to vector<8x32xf32>
    %54 = vector.extract_strided_slice %51 {offsets = [0, 64], sizes = [8, 32], strides = [1, 1]} : vector<8x128xf32> to vector<8x32xf32>
    %55 = vector.extract_strided_slice %51 {offsets = [0, 96], sizes = [8, 32], strides = [1, 1]} : vector<8x128xf32> to vector<8x32xf32>
    %56 = arith.mulf %53, %36 : vector<8x32xf32>
    %57 = arith.mulf %52, %54 : vector<8x32xf32>
    %58 = arith.addf %56, %57 : vector<8x32xf32>
    %59 = math.tanh %58 : vector<8x32xf32>
    %60 = arith.mulf %55, %59 : vector<8x32xf32>
    %c120 = arith.constant 120 : index
    %c0_13 = arith.constant 0 : index
    %61 = vector.load %arg2[%c120, %c0_13] : memref<152x128xf32, #tpu.memory_space<vmem>>, vector<32x128xf32>
    %cst_14 = arith.constant dense<0.000000e+00> : vector<8x128xf32>
    %62 = tpu.matmul %60, %61, %cst_14 {dimension_numbers = #tpu.dot_dimension_numbers<[1], [0], [0], [1], [0, 0, 1, 1], [], []>} : vector<8x32xf32>, vector<32x128xf32>, vector<8x128xf32> -> vector<8x128xf32>
    %c114 = arith.constant 114 : index
    %c0_15 = arith.constant 0 : index
    %63 = vector.load %arg2[%c114, %c0_15] : memref<152x128xf32, #tpu.memory_space<vmem>>, vector<1x128xf32>
    %64 = vector.broadcast %63 : vector<1x128xf32> to vector<8x128xf32>
    %65 = arith.addf %62, %64 : vector<8x128xf32>
    %66 = tpu.concatenate %34, %60, %32, %58 in 1 : vector<8x32xf32>, vector<8x32xf32>, vector<8x32xf32>, vector<8x32xf32> -> vector<8x128xf32>
    %c0_16 = arith.constant 0 : index
    %c0_17 = arith.constant 0 : index
    %67 = vector.load %arg3[%c0_16, %c0_17] : memref<8x128xf32, #tpu.memory_space<vmem>>, vector<8x128xf32>
    tpu.vector_store %arg3[%c0_16, %c0_17], %66 {strides = array<i32>} : memref<8x128xf32, #tpu.memory_space<vmem>>, vector<8x128xf32>,
    %c0_18 = arith.constant 0 : index
    %c0_19 = arith.constant 0 : index
    %68 = vector.load %arg4[%c0_18, %c0_19] : memref<8x128xf32, #tpu.memory_space<vmem>>, vector<8x128xf32>
    tpu.vector_store %arg4[%c0_18, %c0_19], %65 {strides = array<i32>} : memref<8x128xf32, #tpu.memory_space<vmem>>, vector<8x128xf32>,
    return
  }
}

</mosaic_0001>

<bundles_post_ra>
// kernel: decoder_step_packed.1
= control target key start
LH: loop header
LB: loop body
LE: loop exit
PB: predicated region body
PF: predicated region fallthrough
CT: control target
= control target key end

     0   :  { %10 = vsyncpa [#allocation3], 0  ;;  %s731_s0 = inlined_call_operand.vmem [shape: s32[8,1], index: 0, kind: input, shape index: {}]   ;;  %s732_s1 = inlined_call_operand.hbm [shape: f32[8,128], index: 1, kind: input, shape index: {}, may-alias: {1,3}]   ;;  %s733_s2 = inlined_call_operand.hbm [shape: f32[152,128], index: 2, kind: input, shape index: {}]   ;;  %s734_s3 = inlined_call_operand.hbm [shape: f32[8,128], index: 3, kind: output, shape index: {0}, may-alias: {1,3}]   ;;  %s735_s4 = inlined_call_operand.hbm [shape: f32[8,128], index: 4, kind: output, shape index: {1}]  }
   0x1   :  { %11 = vsyncpa [#allocation6], 0 }
   0x2   :  { %12 = vsyncpa [#allocation4], 0 }
   0x3   :  { %13 = vsyncpa [#allocation9], 0  ;;  %s626_s15 = smov [#allocation2]   ;;  %s627_s17 = smov [#allocation5]  }
   0x4   :  { %s22_s16 = sshll.u32 %s626_s15, 4  ;;  %s31_s18 = sshll.u32 %s627_s17, 4  ;;  %s23_s16 = int_to_ptr.vmem [resolvable:$true] %s22_s16  ;;  %s32_s18 = int_to_ptr.vmem [resolvable:$true] %s31_s18 }
   0x5   :  { %s546_s19 = scalar_lea.vmem %s23_s16, 128  ;;  %p551_p1 = scmp.lt.s32.totalorder %s23_s16, %s23_s16 }
   0x6   :  { %p547_p0 = scmp.ne.s32.totalorder %s23_s16, %s546_s19  ;;  %p552_p2 = scmp.lt.s32.totalorder %s546_s19, %s546_s19 }
   0x8   :  { %p553_p3 = por %p552_p2, %p551_p1 }
   0xa   :  { %p554_p4 = pnand %p553_p3, %p547_p0 }
   0xc   :  { %557 = shalt.err (!%p554_p4)
}
   0xd   :  { %25 = dma.hbm_to_vmem [thread:$0]  %s732_s1, 128, %s23_s16, [#allocation3]  }
   0xe   :  { %s566_s22 = scalar_lea.vmem %s32_s18, 2432  ;;  %p571_p6 = scmp.lt.s32.totalorder %s32_s18, %s32_s18 }
   0xf   :  { %p567_p5 = scmp.ne.s32.totalorder %s32_s18, %s566_s22  ;;  %p572_p7 = scmp.lt.s32.totalorder %s566_s22, %s566_s22 }
  0x11   :  { %p573_p8 = por %p572_p7, %p571_p6 }
  0x13   :  { %p574_p9 = pnand %p573_p8, %p567_p5 }
  0x15   :  { %577 = shalt.err (!%p574_p9)
}
  0x16   :  { %s628_s23 = smov 128   ;;  %s629_s24 = smov 8  }
  0x17   :  { %37 = dma.hbm_to_vmem [thread:$0]  %s733_s2, 2432, %s32_s18, [#allocation6], %s628_s23, %s628_s23, %s629_s24  }
  0x18   :  { %618 = dma.done.wait [#allocation3], 128  }
  0x19   :  { %619 = vsyncadd [#allocation3], 4294967168 }
  0x1a   :  { %620 = dma.done.wait [#allocation6], 2432  }
  0x1b   :  { %621 = vsyncadd [#allocation6], 4294964864  ;;  %v630_v0 = vmov 0   ;;  %v631_v1 = vmov 0.0   ;;  %v44_v2 = vld [vmem:[%s731_s0] sm:$0xff]  ;;  %v61_v3 = vld [vmem:[#allocation5 + $0x28] sm:$0xff]  ;;  %v45_v10 = vlaneseq }
  0x1c   :  { %525 = vset.pattern.permute.xlu0 %v630_v0  ;;  %467 = vmatprep.subr.mxu0 %v631_v1  ;;  %v60_v4 = vld [vmem:[#allocation5 + $0x20] sm:$0xff]  ;;  %v675_v5 = vld [vmem:[#allocation2] sm:$0xff]  ;;  %vm632_vm0 = vmmov 0   ;;  %v58_v7 = vld [vmem:[#allocation5 + $0x10] sm:$0xff]  ;;  %s633_s0 = smov 16   ;;  %vm67_vm2 = vcmask 130048  }
  0x1d   :  { %482 = vmatprep.subr.mxu1 %v631_v1  ;;  %48 = vperm.xlu0 %525, %v44_v2   ;;  %v59_v6 = vld [vmem:[#allocation5 + $0x18] sm:$0xff]  ;;  %v57_v8 = vld [vmem:[#allocation5 + $0x8] sm:$0xff]  ;;  %v56_v9 = vld [vmem:[#allocation5] sm:$0xff]  ;;  %v46_v11 = vand.u32 127, %v45_v10  ;;  %vm73_vm3 = vcmask 392192   ;;  %s634_s2 = smov 64  }
  0x1e   :  { %468 = vmatpush3.msra.mxu0 %v61_v3  ;;  %479 = vmatprep.mubr.msk.f32.mxu0 %vm632_vm0, %v631_v1  ;;  %v436_v16 = vld [vmem:[#allocation5 + $0x70] ss:$0 sm:$0xff]  ;;  %v439_v23 = vld [vmem:[#allocation5 + $0x73] ss:$0 sm:$0xff]  ;;  %v440_v25 = vld [vmem:[#allocation5 + $0x74] ss:$0 sm:$0xff] }
  0x1f   :  { %469 = vmatprep.subr.mxu0 %v631_v1  ;;  %498 = vmatprep.mubr.msk.f32.mxu1 %vm632_vm0, %v631_v1  ;;  %s635_s28 = smov 96   ;;  %s636_s29 = smov 32   ;;  %v190_v34 = vld [vmem:[#allocation5 + $0x68] sm:$0xff]  ;;  %v189_v35 = vld [vmem:[#allocation5 + $0x60] sm:$0xff]  ;;  %v188_v36 = vld [vmem:[#allocation5 + $0x58] sm:$0xff]  ;;  %vm196_vm4 = vcmask 261120  }
  0x20   :  { %470 = vmatpush3.msra.mxu0 %v60_v4  ;;  %483 = vmatpush3.msra.mxu1 %v190_v34  ;;  %v187_v37 = vld [vmem:[#allocation5 + $0x50] sm:$0xff]  ;;  %v186_v38 = vld [vmem:[#allocation5 + $0x48] sm:$0xff]  ;;  %v185_v39 = vld [vmem:[#allocation5 + $0x40] sm:$0xff]  ;;  %vm202_vm5 = vcmask 523264   ;;  %vm401_vm6 = vcmask 785408   ;;  %s637_s30 = smov [#allocation7]  }
  0x21   :  { %471 = vmatprep.subr.mxu0 %v631_v1  ;;  %64 = vrot.lane.b32.xlu0 %v675_v5, %s633_s0  ;;  %v184_v41 = vld [vmem:[#allocation5 + $0x38] sm:$0xff]  ;;  %v183_v42 = vld [vmem:[#allocation5 + $0x30] sm:$0xff]  ;;  %v306_v0 = vld [vmem:[#allocation5 + $0x88] sm:$0xff]  ;;  %s411_s5 = sshll.u32 %s637_s30, 4  ;;  %s412_s5 = int_to_ptr.vmem [resolvable:$true] %s411_s5 }
  0x22   :  { %472 = vmatpush3.msra.mxu0 %v59_v6  ;;  %484 = vmatprep.subr.mxu1 %v631_v1  ;;  %v441_v47 = vld [vmem:[#allocation5 + $0x71] ss:$0 sm:$0xff]  ;;  %v305_v2 = vld [vmem:[#allocation5 + $0x80] sm:$0xff]  ;;  %v304_v3 = vld [vmem:[#allocation5 + $0x78] sm:$0xff]  ;;  %s578_s6 = scalar_lea.vmem %s412_s5, 128  ;;  %p583_p11 = scmp.lt.s32.totalorder %s412_s5, %s412_s5 }
  0x23   :  { %473 = vmatprep.subr.mxu0 %v631_v1  ;;  %485 = vmatpush3.msra.mxu1 %v189_v35  ;;  %v307_v63 = vld [vmem:[#allocation5 + $0x90] sm:$0xff]  ;;  %p579_p10 = scmp.ne.s32.totalorder %s412_s5, %s578_s6  ;;  %p584_p12 = scmp.lt.s32.totalorder %s578_s6, %s578_s6 }
  0x24   :  { %474 = vmatpush3.msra.mxu0 %v58_v7  ;;  %486 = vmatprep.subr.mxu1 %v631_v1 }
  0x25   :  { %475 = vmatprep.subr.mxu0 %v631_v1  ;;  %487 = vmatpush3.msra.mxu1 %v188_v36  ;;  %p585_p13 = por %p584_p12, %p583_p11 }
  0x26   :  { %476 = vmatpush3.msra.mxu0 %v57_v8  ;;  %488 = vmatprep.subr.mxu1 %v631_v1 }
  0x27   :  { %477 = vmatprep.subr.mxu0 %v631_v1  ;;  %489 = vmatpush3.msra.mxu1 %v187_v37  ;;  %p586_p0 = pnand %p585_p13, %p579_p10 }
  0x28   :  { %478 = vmatpush3.msra.mxu0 %v56_v9  ;;  %490 = vmatprep.subr.mxu1 %v631_v1 }
  0x29   :  { %501 = vmatprep.subr.mxu0 %v631_v1  ;;  %491 = vmatpush3.msra.mxu1 %v186_v38 }
  0x2a   :  { %492 = vmatprep.subr.mxu1 %v631_v1 }
  0x2b   :  { %493 = vmatpush3.msra.mxu1 %v185_v39 }
  0x2c   :  { %494 = vmatprep.subr.mxu1 %v631_v1 }
  0x2d   :  { %495 = vmatpush3.msra.mxu1 %v184_v41 }
  0x2e   :  { %496 = vmatprep.subr.mxu1 %v631_v1 }
  0x2f   :  { %497 = vmatpush3.msra.mxu1 %v183_v42 }
  0x98   :  { %v49_v12 = vpop.permute.xlu0 %48 }
  0x99   :  { %vm50_vm1 = vcmp.eq.s32.totalorder %v46_v11, %v49_v12 }
  0x9a   :  { %v435_v13 = vsel %vm50_vm1, 1.0, %v631_v1 }
  0x9c   :  { %v65_v14 = vpop.permute.xlu0 %64 }
  0x9d   :  { %v68_v15 = vsel %vm67_vm2, %v435_v13, %v65_v14 }
  0x9e   :  { %480 = vmatmul.mubr.msk.f32.vlgmr.msra.gmra.mxu0 %vm73_vm3, %v68_v15 }
  0x9f   :  { %509 = vmatprep.mubr.msk.f32.mxu0 %vm632_vm0, %v631_v1  ;;  %502 = vmatpush3.msra.mxu0 %v307_v63 }
  0xa0   :  { %503 = vmatprep.subr.mxu0 %v631_v1 }
  0xa1   :  { %504 = vmatpush3.msra.mxu0 %v306_v0 }
  0xa2   :  { %505 = vmatprep.subr.mxu0 %v631_v1 }
  0xa3   :  { %506 = vmatpush3.msra.mxu0 %v305_v2 }
  0xa4   :  { %507 = vmatprep.subr.mxu0 %v631_v1 }
  0xa5   :  { %508 = vmatpush3.msra.mxu0 %v304_v3 }
 0x15e   :  { %v143_v17 = vpop.f32.mrf.mxu0 }
 0x15f   :  { %v144_v18 = vadd.f32 %v436_v16, %v143_v17 }
 0x160   :  { %v481_v19 = vpop.f32.mrf.mxu0 }
 0x161   :  { %v438_v20 = vmul.f32 -1.442695, %v144_v18 }
 0x163   :  { %526 = vpow2.f32 %v438_v20 }
 0x170   :  { %v527_v21 = vpop.eup %526 }
 0x171   :  { %v150_v22 = vadd.f32 1.0, %v527_v21 }
 0x173   :  { %528 = vrcp.f32 %v150_v22 }
 0x180   :  { %v529_v24 = vpop.eup %528 }
 0x181   :  { %v157_v26 = vmul.f32 %v529_v24, %v439_v23 }
 0x183   :  { %v162_v27 = vadd.f32 %v440_v25, %v157_v26 }
 0x185   :  { %168 = vrot.lane.b32.xlu1 %v162_v27, %s634_s2 }
 0x189   :  { %163 = vrot.lane.b32.xlu1 %v675_v5, %s635_s28 }
 0x1f7   :  { %v169_v28 = vpop.permute.xlu1 %168 }
 0x1f8   :  { %v171_v29 = vmul.f32 %v169_v28, %v162_v27 }
 0x1fa   :  { %173 = vrot.lane.b32.xlu0 %v171_v29, %s636_s29 }
 0x1fb   :  { %v164_v30 = vpop.permute.xlu1 %163 }
 0x1fc   :  { %v166_v31 = vmul.f32 %v164_v30, %v162_v27 }
 0x26c   :  { %v174_v32 = vpop.permute.xlu0 %173 }
 0x26d   :  { %v694_v33 = vadd.f32 %v174_v32, %v166_v31 }
 0x26f   :  { %530 = vtanh.f32 %v694_v33 }
 0x27c   :  { %v531_v40 = vpop.eup %530 }
 0x27d   :  { %179 = vrot.lane.b32.xlu1 %v531_v40, %s634_s2 }
 0x2ef   :  { %v180_v43 = vpop.permute.xlu1 %179 }
 0x2f0   :  { %v182_v44 = vmul.f32 %v180_v43, %v162_v27 }
 0x2f2   :  { %193 = vrot.lane.b32.xlu0 %v182_v44, %s636_s29 }
 0x2f6   :  { %284 = vrot.lane.b32.xlu0 %v675_v5, %s634_s2 }
 0x364   :  { %v194_v45 = vpop.permute.xlu0 %193 }
 0x365   :  { %v197_v46 = vsel %vm196_vm4, %v194_v45, %v675_v5 }
 0x366   :  { %499 = vmatmul.mubr.msk.f32.vlgmr.msra.gmra.mxu1 %vm202_vm5, %v197_v46 }
 0x368   :  { %v285_v59 = vpop.permute.xlu0 %284 }
 0x426   :  { %v272_v48 = vpop.f32.mrf.mxu1 }
 0x427   :  { %v273_v49 = vadd.f32 %v441_v47, %v272_v48 }
 0x428   :  { %v500_v50 = vpop.f32.mrf.mxu1 }
 0x429   :  { %v443_v51 = vmul.f32 -1.442695, %v273_v49 }
 0x42b   :  { %532 = vpow2.f32 %v443_v51 }
 0x438   :  { %v533_v52 = vpop.eup %532 }
 0x439   :  { %v279_v53 = vadd.f32 1.0, %v533_v52 }
 0x43b   :  { %534 = vrcp.f32 %v279_v53 }
 0x448   :  { %v535_v54 = vpop.eup %534 }
 0x449   :  { %v282_v55 = vmul.f32 %v535_v54, %v439_v23 }
 0x44b   :  { %v283_v56 = vadd.f32 %v440_v25, %v282_v55 }
 0x44d   :  { %289 = vrot.lane.b32.xlu1 %v283_v56, %s634_s2  ;;  %v287_v60 = vmul.f32 %v285_v59, %v283_v56 }
 0x4bf   :  { %v290_v57 = vpop.permute.xlu1 %289 }
 0x4c0   :  { %v292_v58 = vmul.f32 %v290_v57, %v283_v56 }
 0x4c2   :  { %294 = vrot.lane.b32.xlu1 %v292_v58, %s636_s29 }
 0x534   :  { %v295_v61 = vpop.permute.xlu1 %294 }
 0x535   :  { %v297_v62 = vadd.f32 %v295_v61, %v287_v60 }
 0x537   :  { %536 = vtanh.f32 %v297_v62 }
 0x544   :  { %v537_v4 = vpop.eup %536 }
 0x545   :  { %300 = vrot.lane.b32.xlu0 %v537_v4, %s634_s2 }
 0x5b7   :  { %v301_v5 = vpop.permute.xlu0 %300 }
 0x5b8   :  { %v303_v6 = vmul.f32 %v301_v5, %v283_v56 }
 0x5ba   :  { %388 = vrot.lane.b32.xlu0 %v303_v6, %s634_s2  ;;  %314 = vrot.lane.b32.xlu1 %v303_v6, %s636_s29 }
 0x5be   :  { %396 = vrot.lane.b32.xlu0 %v297_v62, %s634_s2  ;;  %392 = vrot.lane.b32.xlu1 %v694_v33, %s636_s29 }
 0x62c   :  { %v389_v7 = vpop.permute.xlu0 %388  ;;  %v315_v8 = vpop.permute.xlu1 %314 }
 0x62d   :  { %510 = vmatmul.mubr.msk.f32.vlgmr.msra.gmra.mxu0 %vm196_vm4, %v315_v8  ;;  %v399_v1 = vsel %vm196_vm4, %v194_v45, %v389_v7 }
 0x630   :  { %v397_v9 = vpop.permute.xlu0 %396  ;;  %v393_v10 = vpop.permute.xlu1 %392 }
 0x631   :  { %v400_v11 = vsel %vm202_vm5, %v399_v1, %v393_v10 }
 0x632   :  { %v402_v12 = vsel %vm401_vm6, %v400_v11, %v397_v9 }
 0x633   :  { %403 = vst [vmem:[#allocation7] sm:$0xff] %v402_v12 }
 0x634   :  { %589 = shalt.err (!%p586_p0)
}
 0x635   :  { %414 = dma.vmem_to_hbm [thread:$0]  %s412_s5, 128, %s734_s3, [#allocation4]   ;;  %v444_v13 = vld [vmem:[#allocation5 + $0x72] ss:$0 sm:$0xff] }
 0x636   :  { %s638_s9 = smov [#allocation8]  }
 0x637   :  { %s421_s10 = sshll.u32 %s638_s9, 4  ;;  %s422_s10 = int_to_ptr.vmem [resolvable:$true] %s421_s10 }
 0x638   :  { %s598_s11 = scalar_lea.vmem %s422_s10, 128  ;;  %p603_p2 = scmp.lt.s32.totalorder %s422_s10, %s422_s10 }
 0x639   :  { %p599_p1 = scmp.ne.s32.totalorder %s422_s10, %s598_s11  ;;  %p604_p3 = scmp.lt.s32.totalorder %s598_s11, %s598_s11 }
 0x63b   :  { %p605_p4 = por %p604_p3, %p603_p2 }
 0x63d   :  { %p606_p5 = pnand %p605_p4, %p599_p1 }
 0x6ed   :  { %v384_v14 = vpop.f32.mrf.mxu0 }
 0x6ee   :  { %v385_v15 = vadd.f32 %v444_v13, %v384_v14 }
 0x6ef   :  { %v511_v16 = vpop.f32.mrf.mxu0 }
 0x6f0   :  { %404 = vst [vmem:[#allocation8] sm:$0xff] %v385_v15 }
 0x6f1   :  { %609 = shalt.err (!%p606_p5)
}
 0x6f2   :  { %424 = dma.vmem_to_hbm [thread:$0]  %s422_s10, 128, %s735_s4, [#allocation9]  }
 0x6f3   :  { %622 = dma.done.wait [#allocation4], 128  }
 0x6f4   :  { %623 = vsyncadd [#allocation4], 4294967168 }
 0x6f5   :  { %624 = dma.done.wait [#allocation9], 128  }
 0x6f6   :  { %625 = vsyncadd [#allocation9], 4294967168 }
 0x6f7   :  { %431 = vsyncpa [#allocation3], 1 }
 0x6f8   :  { %432 = vsyncpa [#allocation6], 1 }
 0x6f9   :  { %433 = vsyncpa [#allocation4], 1 }
 0x6fa   :  { %434 = vsyncpa [#allocation9], 1 }

</bundles_post_ra>
